<compile_context>
chip_gen: v7x
topology: tpu7x:2x2x1
jax: 0.10.0
libtpu: 0.0.40
codegen_flags: <defaults>
</compile_context>

<pallas_src>
import functools

import jax
import jax.numpy as jnp
from jax.experimental import pallas as pl
from jax.experimental.pallas import tpu as pltpu

BN_EPS = 1e-5


def _bn_relu(h, gamma, beta):
    """Training-mode BatchNorm1d (biased variance) + ReLU on an f32 tile."""
    mean = jnp.mean(h, axis=0, keepdims=True)
    centered = h - mean
    var = jnp.mean(centered * centered, axis=0, keepdims=True)
    scale = gamma * jax.lax.rsqrt(var + BN_EPS)   # fold gamma into 1/std (EUP)
    return jnp.maximum(centered * scale + beta, 0.0)


def residual_tiled_kernel(x_ref, wt_ref, gb_ref, out_ref, *, n_bn_tiles, tile_o):
    """One grid step = one [B, tile_o] column tile of the fused [B, O+I] output.

    j <  n_bn_tiles : out[:, j*t:(j+1)*t]     = ReLU(BN(x @ Wt)) tile
    j >= n_bn_tiles : out[:, O+c*t:O+(c+1)*t] = x[:, c*t:(c+1)*t]   (fused concat)
    """
    j = pl.program_id(0)

    @pl.when(j < n_bn_tiles)
    def _compute_bn_tile():
        # No bias add: BN's batch-mean subtraction cancels it exactly.
        h = jnp.dot(x_ref[...], wt_ref[...],
                    preferred_element_type=jnp.float32)
        y = _bn_relu(h,
                     gb_ref[0:1, :].astype(jnp.float32),   # gamma
                     gb_ref[1:2, :].astype(jnp.float32))   # beta
        out_ref[...] = y.astype(out_ref.dtype)

    @pl.when(j >= n_bn_tiles)
    def _copy_x_tile():
        # x is already fully resident in VMEM (constant-index BlockSpec):
        # slice it instead of streaming a second copy of x from HBM.
        start = pl.multiple_of((j - n_bn_tiles) * tile_o, 128)
        out_ref[...] = x_ref[:, pl.ds(start, tile_o)].astype(out_ref.dtype)


def residual_whole_kernel(x_ref, wt_ref, gb_ref, out_ref, *, o_dim):
    """Single-block path (small / odd shapes): one grid step, fused concat."""
    x = x_ref[...]
    h = jnp.dot(x, wt_ref[...], preferred_element_type=jnp.float32)
    y = _bn_relu(h,
                 gb_ref[0:1, :].astype(jnp.float32),
                 gb_ref[1:2, :].astype(jnp.float32))
    # Direct slice stores: no concatenate temporary / relayout.
    out_ref[:, :o_dim] = y.astype(out_ref.dtype)
    out_ref[:, o_dim:] = x.astype(out_ref.dtype)


def _select_tile_o(O, I):
    """Largest 128-multiple tile dividing both O and I; prefer >= 2 BN tiles."""
    best = None
    for t in (512, 384, 256, 128):
        if O % t == 0 and I % t == 0:
            if O // t >= 2:        # keep >=2 parallel BN tiles for v7x megacore
                return t
            if best is None:
                best = t
    return best


def residual_forward(x, wt, b, gamma, beta, *, tile_o=None):
    """Residual layer: concat([ReLU(BN(x @ wt)), x], axis=1).

    x : [B, I]     wt : [I, O] (Linear weight pre-transposed ONCE at init)
    b, gamma, beta : [O]       returns [B, O + I]

    `b` is accepted for parity with nn.Linear but unused: training-mode
    BatchNorm subtracts the per-column batch mean, which cancels the bias.
    """
    del b
    B, I = x.shape
    I_w, O = wt.shape
    assert I_w == I, (I_w, I)
    out_dtype = x.dtype
    out_bytes = jnp.dtype(out_dtype).itemsize

    gb = jnp.stack([gamma, beta], axis=0).astype(jnp.float32)   # [2, O], one DMA

    bytes_accessed = int(B * I * x.dtype.itemsize
                         + I * O * wt.dtype.itemsize
                         + 2 * O * 4
                         + B * (O + I) * out_bytes)
    cost = pl.CostEstimate(flops=2 * B * I * O, transcendentals=O,
                           bytes_accessed=bytes_accessed)

    # Small problems (the common CTGAN sizes) take one grid step: per-step
    # pipeline overhead dominates actual compute there.
    auto = tile_o is None
    if auto:
        tile_o = _select_tile_o(O, I)
    small = bytes_accessed * 2 < (4 << 20)
    use_tiled = (tile_o is not None and tile_o % 128 == 0
                 and O % tile_o == 0 and I % tile_o == 0
                 and not (auto and small))

    if not use_tiled:
        # TODO(synk): a very large problem whose feature dims are not
        # 128-divisible falls through to this single-block path and may
        # exceed VMEM; CTGAN shapes never hit that case.
        return pl.pallas_call(
            functools.partial(residual_whole_kernel, o_dim=O),
            out_shape=jax.ShapeDtypeStruct((B, O + I), out_dtype),
            cost_estimate=cost,
        )(x, wt, gb)

    n_bn = O // tile_o                       # BN/ReLU column tiles
    n_cp = I // tile_o                       # x-copy column tiles (fused concat)
    # Clamp on copy steps -> block index unchanged -> no extra weight DMAs.
    bn_idx = lambda j: (0, jnp.minimum(j, n_bn - 1))

    # VMEM footprint: resident x (counted double-buffered conservatively),
    # double-buffered weight/param/output tiles, live f32 intermediates.
    vmem_needed = (2 * B * I * x.dtype.itemsize
                   + 2 * I * tile_o * wt.dtype.itemsize
                   + 2 * 2 * tile_o * 4
                   + 2 * B * tile_o * out_bytes
                   + 4 * B * tile_o * 4)
    vmem_limit = int(min(max(2 * vmem_needed, 32 << 20), 60 << 20))

    return pl.pallas_call(
        functools.partial(residual_tiled_kernel, n_bn_tiles=n_bn, tile_o=tile_o),
        out_shape=jax.ShapeDtypeStruct((B, O + I), out_dtype),
        grid=(n_bn + n_cp,),
        in_specs=[
            pl.BlockSpec((B, I), lambda j: (0, 0)),     # x, fully resident
            pl.BlockSpec((I, tile_o), bn_idx),          # weight column tile
            pl.BlockSpec((2, tile_o), bn_idx),          # packed gamma/beta tile
        ],
        out_specs=pl.BlockSpec((B, tile_o), lambda j: (0, j)),   # lane-dense
        compiler_params=pltpu.CompilerParams(
            dimension_semantics=("parallel",),          # megacore-shardable
            vmem_limit_bytes=vmem_limit),
        cost_estimate=cost,
    )(x, wt, gb)


def residual_reference(x, w, b, gamma, beta):
    """Pure-JAX reference matching nn.Linear + BatchNorm1d(train) + ReLU + cat."""
    h = x @ w.T + b
    mean = h.mean(axis=0, keepdims=True)
    centered = h - mean
    var = (centered * centered).mean(axis=0, keepdims=True)
    y = gamma * centered * jax.lax.rsqrt(var + BN_EPS) + beta
    return jnp.concatenate([jnp.maximum(y, 0.0), x], axis=1)


if __name__ == "__main__":
    key = jax.random.PRNGKey(0)

    def make_inputs(key, B, I, O):
        kx, kw, kb, kg, kbt = jax.random.split(key, 5)
        x = jax.random.normal(kx, (B, I), dtype=jnp.float32)
        bound = 1.0 / (I ** 0.5)
        w = jax.random.uniform(kw, (O, I), minval=-bound, maxval=bound,
                               dtype=jnp.float32)
        b = jax.random.uniform(kb, (O,), minval=-bound, maxval=bound,
                               dtype=jnp.float32)
        gamma = 1.0 + 0.1 * jax.random.normal(kg, (O,), dtype=jnp.float32)
        beta = 0.1 * jax.random.normal(kbt, (O,), dtype=jnp.float32)
        return x, w, b, gamma, beta

    fwd = jax.jit(residual_forward, static_argnames=("tile_o",))

    # 1) CTGAN-like dims Residual(i=128, o=256): small -> single-block path.
    k1, k2 = jax.random.split(key)
    x, w, b, gamma, beta = make_inputs(k1, 16, 128, 256)
    wt = jnp.transpose(w)                     # pre-transposed ONCE at init
    y = fwd(x, wt, b, gamma, beta)
    jax.block_until_ready(y)
    ref = residual_reference(x, w, b, gamma, beta)
    assert y.shape == (16, 256 + 128), y.shape
    assert jnp.allclose(y, ref, atol=1e-4, rtol=1e-4), \
        float(jnp.max(jnp.abs(y - ref)))

    # 2) Same dims with the tiled lane-dense path forced (exercise pipelining,
    #    fused concat via slicing the resident x block).
    y_t = fwd(x, wt, b, gamma, beta, tile_o=128)
    jax.block_until_ready(y_t)
    assert y_t.shape == (16, 256 + 128), y_t.shape
    assert jnp.allclose(y_t, ref, atol=1e-4, rtol=1e-4), \
        float(jnp.max(jnp.abs(y_t - ref)))

    # 3) Small odd dims (O % 128 != 0): whole-block fallback with masked stores.
    x2, w2, b2, gamma2, beta2 = make_inputs(k2, 8, 32, 64)
    wt2 = jnp.transpose(w2)
    y2 = fwd(x2, wt2, b2, gamma2, beta2)
    jax.block_until_ready(y2)
    ref2 = residual_reference(x2, w2, b2, gamma2, beta2)
    assert y2.shape == (8, 64 + 32), y2.shape
    assert jnp.allclose(y2, ref2, atol=1e-4, rtol=1e-4), \
        float(jnp.max(jnp.abs(y2 - ref2)))

    print("KERNEL_OK")
</pallas_src>

<mosaic_0001>
module attributes {stable_mosaic.version = 11 : i64} {
  func.func @residual_whole_kernel(%arg0: memref<16x128xf32, #tpu.memory_space<vmem>>, %arg1: memref<128x256xf32, #tpu.memory_space<vmem>>, %arg2: memref<2x256xf32, #tpu.memory_space<vmem>>, %arg3: memref<16x384xf32, #tpu.memory_space<vmem>>) attributes {dimension_semantics = [], scalar_prefetch = 0 : i64, scratch_operands = 0 : i64, tpu.core_type = #tpu.core_type<tc>} {
    %c0 = arith.constant 0 : index
    %c0_0 = arith.constant 0 : index
    %0 = vector.load %arg0[%c0, %c0_0] : memref<16x128xf32, #tpu.memory_space<vmem>>, vector<16x128xf32>
    %c0_1 = arith.constant 0 : index
    %c0_2 = arith.constant 0 : index
    %1 = vector.load %arg1[%c0_1, %c0_2] : memref<128x256xf32, #tpu.memory_space<vmem>>, vector<128x256xf32>
    %cst = arith.constant dense<0.000000e+00> : vector<16x256xf32>
    %2 = tpu.matmul %0, %1, %cst {dimension_numbers = #tpu.dot_dimension_numbers<[1], [0], [0], [1], [0, 0, 1, 1], [], []>} : vector<16x128xf32>, vector<128x256xf32>, vector<16x256xf32> -> vector<16x256xf32>
    %c0_3 = arith.constant 0 : index
    %c0_4 = arith.constant 0 : index
    %3 = vector.load %arg2[%c0_3, %c0_4] : memref<2x256xf32, #tpu.memory_space<vmem>>, vector<1x256xf32>
    %c1 = arith.constant 1 : index
    %c0_5 = arith.constant 0 : index
    %4 = vector.load %arg2[%c1, %c0_5] : memref<2x256xf32, #tpu.memory_space<vmem>>, vector<1x256xf32>
    %cst_6 = arith.constant dense<0.000000e+00> : vector<256xf32>
    %5 = vector.multi_reduction <add>, %2, %cst_6 [0] : vector<16x256xf32> to vector<256xf32>
    %6 = vector.shape_cast %5 : vector<256xf32> to vector<1x256xf32>
    %cst_7 = arith.constant 1.600000e+01 : f32
    %7 = vector.broadcast %cst_7 : f32 to vector<1x256xf32>
    %8 = arith.divf %6, %7 : vector<1x256xf32>
    %9 = vector.broadcast %8 : vector<1x256xf32> to vector<16x256xf32>
    %10 = arith.subf %2, %9 : vector<16x256xf32>
    %11 = arith.mulf %10, %10 : vector<16x256xf32>
    %cst_8 = arith.constant dense<0.000000e+00> : vector<256xf32>
    %12 = vector.multi_reduction <add>, %11, %cst_8 [0] : vector<16x256xf32> to vector<256xf32>
    %13 = vector.shape_cast %12 : vector<256xf32> to vector<1x256xf32>
    %cst_9 = arith.constant 1.600000e+01 : f32
    %14 = vector.broadcast %cst_9 : f32 to vector<1x256xf32>
    %15 = arith.divf %13, %14 : vector<1x256xf32>
    %cst_10 = arith.constant 9.99999974E-6 : f32
    %16 = vector.broadcast %cst_10 : f32 to vector<1x256xf32>
    %17 = arith.addf %15, %16 : vector<1x256xf32>
    %18 = math.rsqrt %17 : vector<1x256xf32>
    %19 = arith.mulf %3, %18 : vector<1x256xf32>
    %20 = vector.broadcast %19 : vector<1x256xf32> to vector<16x256xf32>
    %21 = arith.mulf %10, %20 : vector<16x256xf32>
    %22 = vector.broadcast %4 : vector<1x256xf32> to vector<16x256xf32>
    %23 = arith.addf %21, %22 : vector<16x256xf32>
    %cst_11 = arith.constant 0.000000e+00 : f32
    %24 = vector.broadcast %cst_11 : f32 to vector<16x256xf32>
    %25 = arith.maximumf %23, %24 : vector<16x256xf32>
    %c0_12 = arith.constant 0 : index
    %c0_13 = arith.constant 0 : index
    %26 = vector.load %arg3[%c0_12, %c0_13] : memref<16x384xf32, #tpu.memory_space<vmem>>, vector<16x256xf32>
    tpu.vector_store %arg3[%c0_12, %c0_13], %25 {strides = array<i32>} : memref<16x384xf32, #tpu.memory_space<vmem>>, vector<16x256xf32>,
    %c0_14 = arith.constant 0 : index
    %c256 = arith.constant 256 : index
    %27 = vector.load %arg3[%c0_14, %c256] : memref<16x384xf32, #tpu.memory_space<vmem>>, vector<16x128xf32>
    tpu.vector_store %arg3[%c0_14, %c256], %0 {strides = array<i32>} : memref<16x384xf32, #tpu.memory_space<vmem>>, vector<16x128xf32>,
    return
  }
}

</mosaic_0001>

<bundles_post_ra>
// kernel: residual_forward.1
= control target key start
LH: loop header
LB: loop body
LE: loop exit
PB: predicated region body
PF: predicated region fallthrough
CT: control target
= control target key end

     0   :  { %8 = vsyncpa [#allocation3], 0  ;;  %s488_s0 = inlined_call_operand.hbm [shape: f32[16,128], index: 0, kind: input, shape index: {}]   ;;  %s489_s1 = inlined_call_operand.hbm [shape: f32[128,256], index: 1, kind: input, shape index: {}]   ;;  %s490_s2 = inlined_call_operand.vmem [shape: f32[2,256], index: 2, kind: input, shape index: {}]   ;;  %s491_s3 = inlined_call_operand.hbm [shape: f32[16,384], index: 3, kind: output, shape index: {}]  }
   0x1   :  { %9 = vsyncpa [#allocation6], 0 }
   0x2   :  { %10 = vsyncpa [#allocation4], 0  ;;  %s415_s12 = smov [#allocation2]   ;;  %s343_s16 = scalar_lea.hbm %s488_s0, 256 }
   0x3   :  { %s16_s13 = sshll.u32 %s415_s12, 4  ;;  %p344_p0 = scmp.ne.s32.totalorder %s488_s0, %s343_s16  ;;  %s17_s13 = int_to_ptr.vmem [resolvable:$true] %s16_s13 }
   0x4   :  { %p347_p1 = scmp.lt.u32.totalorder %s343_s16, %s488_s0 }
   0x6   :  { %p349_p2 = pnand %p347_p1, %p344_p0 }
   0x8   :  { %352 = shalt.err (!%p349_p2)
}
   0x9   :  { %s353_s21 = scalar_lea.vmem %s17_s13, 256  ;;  %p358_p4 = scmp.lt.s32.totalorder %s17_s13, %s17_s13 }
   0xa   :  { %p354_p3 = scmp.ne.s32.totalorder %s17_s13, %s353_s21  ;;  %p359_p5 = scmp.lt.s32.totalorder %s353_s21, %s353_s21 }
   0xc   :  { %p360_p6 = por %p359_p5, %p358_p4 }
   0xe   :  { %p361_p7 = pnand %p360_p6, %p354_p3 }
  0x10   :  { %364 = shalt.err (!%p361_p7)
}
  0x11   :  { %s416_s22 = smov 128   ;;  %s417_s23 = smov 8  }
  0x12   :  { %22 = dma.hbm_to_vmem [thread:$0]  %s488_s0, 256, %s17_s13, [#allocation3], %s416_s22, %s416_s22, %s417_s23  }
  0x13   :  { %s418_s26 = smov [#allocation5]   ;;  %s365_s30 = scalar_lea.hbm %s489_s1, 4096 }
  0x14   :  { %s28_s27 = sshll.u32 %s418_s26, 4  ;;  %p366_p8 = scmp.ne.s32.totalorder %s489_s1, %s365_s30  ;;  %s29_s27 = int_to_ptr.vmem [resolvable:$true] %s28_s27 }
  0x15   :  { %p369_p9 = scmp.lt.u32.totalorder %s365_s30, %s489_s1 }
  0x17   :  { %p371_p10 = pnand %p369_p9, %p366_p8 }
  0x19   :  { %374 = shalt.err (!%p371_p10)
}
  0x1a   :  { %s375_s8 = scalar_lea.vmem %s29_s27, 4096  ;;  %p380_p12 = scmp.lt.s32.totalorder %s29_s27, %s29_s27 }
  0x1b   :  { %p376_p11 = scmp.ne.s32.totalorder %s29_s27, %s375_s8  ;;  %p381_p13 = scmp.lt.s32.totalorder %s375_s8, %s375_s8 }
  0x1d   :  { %p382_p0 = por %p381_p13, %p380_p12 }
  0x1f   :  { %p383_p1 = pnand %p382_p0, %p376_p11 }
  0x21   :  { %386 = shalt.err (!%p383_p1)
}
  0x22   :  { %s419_s0 = smov 256   ;;  %s420_s9 = smov 16  }
  0x23   :  { %34 = dma.hbm_to_vmem [thread:$0]  %s489_s1, 4096, %s29_s27, [#allocation6], %s419_s0, %s419_s0, %s420_s9  }
  0x24   :  { %409 = dma.done.wait [#allocation3], 256  }
  0x25   :  { %410 = vsyncadd [#allocation3], 4294967040 }
  0x26   :  { %411 = dma.done.wait [#allocation6], 4096  }
  0x27   :  { %412 = vsyncadd [#allocation6], 4294963200  ;;  %v421_v0 = vmov 0.0   ;;  %v46_v1 = vld [vmem:[#allocation5 + $0x8] sm:$0xff]  ;;  %v48_v2 = vld [vmem:[#allocation5 + $0x18] sm:$0xff]  ;;  %s423_s15 = smov [#allocation7]  }
  0x28   :  { %141 = vmatprep.mubr.f32.mxu0 %v421_v0  ;;  %147 = vmatprep.mubr.f32.mxu1 %v421_v0  ;;  %v45_v3 = vld [vmem:[#allocation5] sm:$0xff]  ;;  %v280_v4 = vpack.c.bf16 %v48_v2, %v46_v1  ;;  %v47_v5 = vld [vmem:[#allocation5 + $0x10] sm:$0xff]  ;;  %v50_v6 = vld [vmem:[#allocation5 + $0x28] sm:$0xff]  ;;  %s266_s16 = sshll.u32 %s423_s15, 4  ;;  %s267_s16 = int_to_ptr.vmem [resolvable:$true] %s266_s16 }
  0x29   :  { %v52_v7 = vld [vmem:[#allocation5 + $0x38] sm:$0xff]  ;;  %v282_v8 = vpack.c.bf16 %v47_v5, %v45_v3  ;;  %v49_v10 = vld [vmem:[#allocation5 + $0x20] sm:$0xff]  ;;  %v51_v11 = vld [vmem:[#allocation5 + $0x30] sm:$0xff]  ;;  %p392_p3 = scmp.lt.s32.totalorder %s267_s16, %s267_s16 }
  0x2a   :  { %v284_v9 = vpack.c.bf16 %v52_v7, %v50_v6  ;;  %v54_v12 = vld [vmem:[#allocation5 + $0x48] sm:$0xff]  ;;  %281 = vmatprep.subr.bf16.mxu0 %v280_v4  ;;  %312 = vmatprep.subr.bf16.mxu1 %v280_v4  ;;  %v56_v13 = vld [vmem:[#allocation5 + $0x58] sm:$0xff]  ;;  %v286_v14 = vpack.c.bf16 %v51_v11, %v49_v10  ;;  %v53_v16 = vld [vmem:[#allocation5 + $0x40] sm:$0xff] }
  0x2b   :  { %283 = vmatpush1.bf16.msra.mxu0 %v282_v8  ;;  %320 = vmatpush1.bf16.msra.mxu1 %v282_v8  ;;  %v288_v15 = vpack.c.bf16 %v56_v13, %v54_v12  ;;  %v55_v17 = vld [vmem:[#allocation5 + $0x50] sm:$0xff]  ;;  %v58_v18 = vld [vmem:[#allocation5 + $0x68] sm:$0xff]  ;;  %v60_v19 = vld [vmem:[#allocation5 + $0x78] sm:$0xff] }
  0x2c   :  { %285 = vmatprep.subr.bf16.mxu0 %v284_v9  ;;  %313 = vmatprep.subr.bf16.mxu1 %v284_v9  ;;  %v290_v20 = vpack.c.bf16 %v55_v17, %v53_v16  ;;  %v292_v21 = vpack.c.bf16 %v60_v19, %v58_v18  ;;  %v57_v22 = vld [vmem:[#allocation5 + $0x60] sm:$0xff]  ;;  %v59_v23 = vld [vmem:[#allocation5 + $0x70] sm:$0xff]  ;;  %v62_v24 = vld [vmem:[#allocation5 + $0x88] sm:$0xff] }
  0x2d   :  { %v64_v25 = vld [vmem:[#allocation5 + $0x98] sm:$0xff]  ;;  %v43_v26 = vld [vmem:[#allocation2] sm:$0xff]  ;;  %v294_v28 = vpack.c.bf16 %v59_v23, %v57_v22  ;;  %v61_v30 = vld [vmem:[#allocation5 + $0x80] sm:$0xff] }
  0x2e   :  { %259 = vst [vmem:[#allocation7 + $0x10] sm:$0xff] %v43_v26  ;;  %v44_v27 = vld [vmem:[#allocation2 + $0x8] sm:$0xff]  ;;  %v296_v29 = vpack.c.bf16 %v64_v25, %v62_v24  ;;  %v63_v31 = vld [vmem:[#allocation5 + $0x90] sm:$0xff]  ;;  %v66_v32 = vld [vmem:[#allocation5 + $0xa8] sm:$0xff] }
  0x2f   :  { %287 = vmatpush1.bf16.msra.mxu0 %v286_v14  ;;  %321 = vmatpush1.bf16.msra.mxu1 %v286_v14  ;;  %260 = vst [vmem:[#allocation7 + $0x28] sm:$0xff] %v44_v27  ;;  %v68_v33 = vld [vmem:[#allocation5 + $0xb8] sm:$0xff]  ;;  %v298_v34 = vpack.c.bf16 %v63_v31, %v61_v30  ;;  %v65_v36 = vld [vmem:[#allocation5 + $0xa0] sm:$0xff]  ;;  %v67_v37 = vld [vmem:[#allocation5 + $0xb0] sm:$0xff] }
  0x30   :  { %289 = vmatprep.subr.bf16.mxu0 %v288_v15  ;;  %314 = vmatprep.subr.bf16.mxu1 %v288_v15  ;;  %v300_v35 = vpack.c.bf16 %v68_v33, %v66_v32  ;;  %v70_v38 = vld [vmem:[#allocation5 + $0xc8] sm:$0xff]  ;;  %v72_v39 = vld [vmem:[#allocation5 + $0xd8] sm:$0xff]  ;;  %v302_v40 = vpack.c.bf16 %v67_v37, %v65_v36  ;;  %v69_v42 = vld [vmem:[#allocation5 + $0xc0] sm:$0xff]  ;;  %v422_v33 = vmov 1966171168  }
  0x31   :  { %v304_v41 = vpack.c.bf16 %v72_v39, %v70_v38  ;;  %v71_v43 = vld [vmem:[#allocation5 + $0xd0] sm:$0xff]  ;;  %v74_v44 = vld [vmem:[#allocation5 + $0xe8] sm:$0xff]  ;;  %v76_v45 = vld [vmem:[#allocation5 + $0xf8] sm:$0xff] }
  0x32   :  { %v306_v46 = vpack.c.bf16 %v71_v43, %v69_v42  ;;  %v308_v47 = vpack.c.bf16 %v76_v45, %v74_v44  ;;  %v73_v48 = vld [vmem:[#allocation5 + $0xe0] sm:$0xff]  ;;  %v75_v49 = vld [vmem:[#allocation5 + $0xf0] sm:$0xff] }
  0x33   :  { %291 = vmatpush1.bf16.msra.mxu0 %v290_v20  ;;  %322 = vmatpush1.bf16.msra.mxu1 %v290_v20  ;;  %v310_v50 = vpack.c.bf16 %v75_v49, %v73_v48  ;;  %v154_v43 = vld [vmem:[%s490_s2] ss:$2 sm:$0x3] }
  0x34   :  { %293 = vmatprep.subr.bf16.mxu0 %v292_v21  ;;  %315 = vmatprep.subr.bf16.mxu1 %v292_v21 }
  0x37   :  { %295 = vmatpush1.bf16.msra.mxu0 %v294_v28  ;;  %323 = vmatpush1.bf16.msra.mxu1 %v294_v28 }
  0x38   :  { %297 = vmatprep.subr.bf16.mxu0 %v296_v29  ;;  %316 = vmatprep.subr.bf16.mxu1 %v296_v29 }
  0x3b   :  { %299 = vmatpush1.bf16.msra.mxu0 %v298_v34  ;;  %324 = vmatpush1.bf16.msra.mxu1 %v298_v34  ;;  %v206_v34 = vunpack.c.l.s4 %v422_v33 }
  0x3c   :  { %301 = vmatprep.subr.bf16.mxu0 %v300_v35  ;;  %317 = vmatprep.subr.bf16.mxu1 %v300_v35  ;;  %v208_v35 = vlaneseq }
  0x3d   :  { %v207_v36 = vunpack.c.0.s8 %v206_v34 }
  0x3e   :  { %v209_v37 = vshrl.u32 %v208_v35, 7 }
  0x3f   :  { %303 = vmatpush1.bf16.msra.mxu0 %v302_v40  ;;  %325 = vmatpush1.bf16.msra.mxu1 %v302_v40 }
  0x40   :  { %305 = vmatprep.subr.bf16.mxu0 %v304_v41  ;;  %318 = vmatprep.subr.bf16.mxu1 %v304_v41  ;;  %v210_v39 = vsub.s32 %v207_v36, %v209_v37  ;;  %v224_v45 = vsub.s32 0, %v209_v37 }
  0x43   :  { %307 = vmatpush1.bf16.msra.mxu0 %v306_v46  ;;  %326 = vmatpush1.bf16.msra.mxu1 %v306_v46  ;;  %v228_v46 = vsub.s32 1, %v209_v37 }
  0x44   :  { %309 = vmatprep.subr.bf16.mxu0 %v308_v47  ;;  %319 = vmatprep.subr.bf16.mxu1 %v308_v47  ;;  %v279_v47 = vld [vmem:[%s490_s2 + $0x1] ss:$2 sm:$0x3]  ;;  %s387_s2 = scalar_lea.vmem %s267_s16, 768 }
  0x45   :  { %p388_p2 = scmp.ne.s32.totalorder %s267_s16, %s387_s2  ;;  %p393_p4 = scmp.lt.s32.totalorder %s387_s2, %s387_s2 }
  0x47   :  { %311 = vmatpush1.bf16.msra.mxu0 %v310_v50  ;;  %327 = vmatpush1.bf16.msra.mxu1 %v310_v50  ;;  %p394_p5 = por %p393_p4, %p392_p3 }
  0x49   :  { %p395_p6 = pnand %p394_p5, %p388_p2 }
  0x4a   :  { %142 = vmatmul.mubr.f32.vlgmr.msra.gmra.mrb[0].mxu0 %v43_v26  ;;  %148 = vmatmul.mubr.f32.vlgmr.msra.gmra.mrb[0].mxu1 %v44_v27 }
 0x11d   :  { %v143_v51 = vpop.f32.mrb[0].mxu0  ;;  %v149_v52 = vpop.f32.mrb[0].mxu1 }
 0x11e   :  { %v157_v53 = vadd.f32 %v149_v52, %v143_v51  ;;  %v145_v54 = vpop.f32.mrb[1].mxu0  ;;  %v151_v55 = vpop.f32.mrb[1].mxu1 }
 0x11f   :  { %v164_v56 = vadd.f32 %v151_v55, %v145_v54 }
 0x120   :  { %v158_v57 = vrot.slane %v157_v53, 4 }
 0x121   :  { %v165_v58 = vrot.slane %v164_v56, 4 }
 0x122   :  { %v159_v59 = vadd.f32 %v158_v57, %v157_v53 }
 0x123   :  { %v166_v60 = vadd.f32 %v165_v58, %v164_v56 }
 0x124   :  { %v160_v61 = vrot.slane %v159_v59, 2 }
 0x125   :  { %v167_v62 = vrot.slane %v166_v60, 2 }
 0x126   :  { %v161_v63 = vadd.f32 %v160_v61, %v159_v59 }
 0x127   :  { %v168_v0 = vadd.f32 %v167_v62, %v166_v60 }
 0x128   :  { %v162_v1 = vrot.slane %v161_v63, 1 }
 0x129   :  { %v169_v2 = vrot.slane %v168_v0, 1 }
 0x12a   :  { %v163_v3 = vadd.f32 %v162_v1, %v161_v63 }
 0x12b   :  { %v170_v4 = vadd.f32 %v169_v2, %v168_v0 }
 0x12c   :  { %v172_v5 = vmul.f32 0.0625, %v163_v3 }
 0x12d   :  { %v173_v6 = vmul.f32 0.0625, %v170_v4 }
 0x12e   :  { %v174_v7 = vsub.f32 %v143_v51, %v172_v5  ;;  %v176_v8 = vsub.f32 %v149_v52, %v172_v5  ;;  %v240_v51 = vrot.slane %v279_v47, %v224_v45  ;;  %v244_v52 = vrot.slane %v279_v47, %v228_v46 }
 0x12f   :  { %v175_v9 = vsub.f32 %v145_v54, %v173_v6  ;;  %v177_v10 = vsub.f32 %v151_v55, %v173_v6 }
 0x130   :  { %v178_v11 = vmul.f32 %v174_v7, %v174_v7  ;;  %v180_v12 = vmul.f32 %v176_v8, %v176_v8 }
 0x131   :  { %v179_v13 = vmul.f32 %v175_v9, %v175_v9  ;;  %v181_v14 = vmul.f32 %v177_v10, %v177_v10 }
 0x132   :  { %v182_v15 = vadd.f32 %v180_v12, %v178_v11 }
 0x133   :  { %v189_v16 = vadd.f32 %v181_v14, %v179_v13 }
 0x134   :  { %v183_v17 = vrot.slane %v182_v15, 4 }
 0x135   :  { %v190_v18 = vrot.slane %v189_v16, 4 }
 0x136   :  { %v184_v19 = vadd.f32 %v183_v17, %v182_v15 }
 0x137   :  { %v191_v20 = vadd.f32 %v190_v18, %v189_v16 }
 0x138   :  { %v185_v21 = vrot.slane %v184_v19, 2 }
 0x139   :  { %v192_v22 = vrot.slane %v191_v20, 2 }
 0x13a   :  { %v186_v23 = vadd.f32 %v185_v21, %v184_v19 }
 0x13b   :  { %v193_v24 = vadd.f32 %v192_v22, %v191_v20 }
 0x13c   :  { %v187_v25 = vrot.slane %v186_v23, 1 }
 0x13d   :  { %v194_v26 = vrot.slane %v193_v24, 1 }
 0x13e   :  { %v188_v27 = vadd.f32 %v187_v25, %v186_v23 }
 0x13f   :  { %v195_v28 = vadd.f32 %v194_v26, %v193_v24 }
 0x140   :  { %v196_v29 = vmul.f32 0.0625, %v188_v27 }
 0x141   :  { %v197_v30 = vmul.f32 0.0625, %v195_v28 }
 0x142   :  { %v198_v31 = vadd.f32 1e-05, %v196_v29 }
 0x143   :  { %v199_v32 = vadd.f32 1e-05, %v197_v30 }
 0x144   :  { %339 = vrsqrt.f32 %v198_v31 }
 0x145   :  { %341 = vrsqrt.f32 %v199_v32 }
 0x14e   :  { %v340_v38 = vpop.eup %339 }
 0x14f   :  { %v342_v40 = vpop.eup %341 }
 0x150   :  { %v204_v41 = vcombine.low %v340_v38, %v342_v40 }
 0x152   :  { %v211_v42 = vrot.slane %v204_v41, %v210_v39 }
 0x154   :  { %v218_v44 = vrot.slane %v211_v42, %v210_v39 }
 0x156   :  { %v220_v48 = vmul.f32 %v218_v44, %v154_v43 }
 0x158   :  { %v225_v49 = vrot.slane %v220_v48, %v224_v45  ;;  %v229_v50 = vrot.slane %v220_v48, %v228_v46 }
 0x15a   :  { %v232_v53 = vmul.f32 %v225_v49, %v174_v7  ;;  %v233_v54 = vmul.f32 %v229_v50, %v175_v9  ;;  %v234_v55 = vmul.f32 %v225_v49, %v176_v8  ;;  %v235_v56 = vmul.f32 %v229_v50, %v177_v10 }
 0x15c   :  { %v247_v57 = vadd.f32 %v240_v51, %v232_v53  ;;  %v248_v58 = vadd.f32 %v244_v52, %v233_v54  ;;  %v249_v59 = vadd.f32 %v240_v51, %v234_v55  ;;  %v250_v60 = vadd.f32 %v244_v52, %v235_v56 }
 0x15e   :  { %v251_v61 = vmax.f32 %v247_v57, 0.0  ;;  %v252_v62 = vmax.f32 %v248_v58, 0.0  ;;  %v253_v63 = vmax.f32 %v249_v59, 0.0  ;;  %v254_v0 = vmax.f32 %v250_v60, 0.0 }
 0x160   :  { %255 = vst [vmem:[#allocation7] sm:$0xff] %v251_v61  ;;  %256 = vst [vmem:[#allocation7 + $0x8] sm:$0xff] %v252_v62 }
 0x161   :  { %257 = vst [vmem:[#allocation7 + $0x18] sm:$0xff] %v253_v63  ;;  %258 = vst [vmem:[#allocation7 + $0x20] sm:$0xff] %v254_v0 }
 0x162   :  { %398 = shalt.err (!%p395_p6)
}
 0x163   :  { %s399_s19 = scalar_lea.hbm %s491_s3, 768 }
 0x164   :  { %p400_p7 = scmp.ne.s32.totalorder %s491_s3, %s399_s19  ;;  %p403_p8 = scmp.lt.u32.totalorder %s399_s19, %s491_s3 }
 0x166   :  { %p405_p9 = pnand %p403_p8, %p400_p7 }
 0x168   :  { %408 = shalt.err (!%p405_p9)
}
 0x169   :  { %s424_s24 = smov 384   ;;  %s425_s25 = smov 24  }
 0x16a   :  { %272 = dma.vmem_to_hbm [thread:$0]  %s267_s16, 768, %s491_s3, [#allocation4], %s424_s24, %s424_s24, %s425_s25  }
 0x16b   :  { %413 = dma.done.wait [#allocation4], 768  }
 0x16c   :  { %414 = vsyncadd [#allocation4], 4294966528 }
 0x16d   :  { %276 = vsyncpa [#allocation3], 1 }
 0x16e   :  { %277 = vsyncpa [#allocation6], 1 }
 0x16f   :  { %278 = vsyncpa [#allocation4], 1 }

</bundles_post_ra>
